<compile_context>
chip_gen: v7x
topology: tpu7x:2x2x1
jax: 0.10.0
libtpu: 0.0.40
codegen_flags: <defaults>
</compile_context>

<pallas_src>
import jax
import jax.numpy as jnp
from jax.experimental import pallas as pl
from jax.experimental.pallas import tpu as pltpu

_LANE = 128


def _round_up(x: int, m: int) -> int:
    return ((x + m - 1) // m) * m


def _box_area_kernel(bt_ref, o_ref):
    # bt_ref: (4, TILE_N)  -- rows are x1, y1, x2, y2 (lane-dense).
    # o_ref : (1, TILE_N)  -- per-box area, lane-dense store.
    x1 = bt_ref[0:1, :]
    y1 = bt_ref[1:2, :]
    x2 = bt_ref[2:3, :]
    y2 = bt_ref[3:4, :]
    o_ref[...] = (x2 - x1) * (y2 - y1)


def _box_area_pallas(boxes: jax.Array, *, max_tile_n: int = 65536) -> jax.Array:
    """Pallas path: lane-dense (4, N) relayout, tiled over N."""
    assert boxes.ndim == 2 and boxes.shape[1] >= 4
    assert max_tile_n % _LANE == 0
    n, _ = boxes.shape
    dtype = boxes.dtype

    # One-time relayout to a lane-dense slab: (4, N), row r = coordinate r.
    bt = boxes[:, :4].T

    # Tile size selection:
    #  * lane dim (TILE_N) must be a multiple of 128 unless it spans all of N.
    #  * target ~1 MiB+ of HBM data per grid step for large N.
    #  * if everything fits in one tile but N is large, split into >=2 tiles
    #    so v7x's two TensorCores can both run ("parallel" grid axis).
    if n > max_tile_n:
        tile_n = max_tile_n
    elif n >= 4 * _LANE:
        tile_n = min(_round_up(pl.cdiv(n, 2), _LANE), max_tile_n)
    else:
        tile_n = n
    num_tiles = pl.cdiv(n, tile_n)

    itemsize = jnp.dtype(dtype).itemsize
    cost = pl.CostEstimate(
        flops=3 * n,                                   # 2 subs + 1 mul per box
        transcendentals=0,
        bytes_accessed=4 * n * itemsize + n * itemsize,
    )

    out = pl.pallas_call(
        _box_area_kernel,
        out_shape=jax.ShapeDtypeStruct((num_tiles, tile_n), dtype),
        grid=(num_tiles,),
        in_specs=[pl.BlockSpec((4, tile_n), lambda i: (0, i))],
        out_specs=pl.BlockSpec((1, tile_n), lambda i: (i, 0)),
        compiler_params=pltpu.CompilerParams(
            dimension_semantics=("parallel",),
            # Padded double-buffered footprint at TILE_N=65536 (f32) is ~8 MiB,
            # well inside v7x's 64 MiB physical / 32 MiB scoped budget.
            vmem_limit_bytes=32 * 1024 * 1024,
        ),
        cost_estimate=cost,
    )(bt)

    # (num_tiles, tile_n) is contiguous -> flatten is free; drop the padded
    # tail produced by the (clipped) partial last input tile.
    return out.reshape(-1)[:n]


def box_area(boxes: jax.Array, *, min_pallas_n: int = 32768,
             max_tile_n: int = 65536) -> jax.Array:
    """boxes: (N, >=4); returns (N,) areas, matching torch `box_area`."""
    assert boxes.ndim == 2 and boxes.shape[1] >= 4
    if boxes.shape[0] < min_pallas_n:
        # Small/medium N: this op is trivially HBM-bound and the fused XLA
        # elementwise expression is already near roofline; skip kernel overhead.
        return (boxes[:, 2] - boxes[:, 0]) * (boxes[:, 3] - boxes[:, 1])
    return _box_area_pallas(boxes, max_tile_n=max_tile_n)


if __name__ == "__main__":
    key = jax.random.PRNGKey(0)

    def make_boxes(k, n, c=5):
        k1, k2, k3 = jax.random.split(k, 3)
        xy = jax.random.uniform(k1, (n, 2), dtype=jnp.float32) * 5.0
        wh = jax.random.uniform(k2, (n, 2), dtype=jnp.float32) * 5.0
        extra = jax.random.uniform(k3, (n, c - 4), dtype=jnp.float32)
        return jnp.concatenate([xy, xy + wh, extra], axis=1)  # (n, c)

    def ref_area(b):
        return (b[:, 2] - b[:, 0]) * (b[:, 3] - b[:, 1])

    k0, k1 = jax.random.split(key)

    # 1) Spec shape (20, 5): run the Pallas kernel directly (single block).
    boxes_small = make_boxes(k0, 20, 5)
    area_pallas = jax.block_until_ready(_box_area_pallas(boxes_small))
    assert area_pallas.shape == (20,)
    assert jnp.allclose(area_pallas, ref_area(boxes_small), rtol=1e-6, atol=1e-6)

    # Wrapper (small-N XLA fallback path) must agree too.
    area_fb = jax.block_until_ready(box_area(boxes_small))
    assert jnp.allclose(area_fb, ref_area(boxes_small), rtol=1e-6, atol=1e-6)

    # 2) Multi-tile grid with a partial last tile: N=300, tile=128 -> 3 tiles,
    #    last tile clipped; padded output tail is discarded in the wrapper.
    boxes_big = make_boxes(k1, 300, 5)
    area_big = jax.block_until_ready(_box_area_pallas(boxes_big, max_tile_n=128))
    assert area_big.shape == (300,)
    assert jnp.allclose(area_big, ref_area(boxes_big), rtol=1e-6, atol=1e-6)

    print("KERNEL_OK")
</pallas_src>

<mosaic_0001>
module attributes {stable_mosaic.version = 11 : i64} {
  func.func @_box_area_kernel(%arg0: i32, %arg1: memref<4x20xf32, #tpu.memory_space<vmem>>, %arg2: memref<1x20xf32, #tpu.memory_space<vmem>>) attributes {dimension_semantics = [#tpu.dimension_semantics<parallel>], iteration_bounds = array<i64: 1>, scalar_prefetch = 0 : i64, scratch_operands = 0 : i64, tpu.core_type = #tpu.core_type<tc>, window_params = [{transform_indices = @transform_0, window_bounds = array<i64: 4, 20>}, {transform_indices = @transform_1, window_bounds = array<i64: 1, 20>}]} {
    %c0 = arith.constant 0 : index
    %c0_0 = arith.constant 0 : index
    %0 = vector.load %arg1[%c0, %c0_0] : memref<4x20xf32, #tpu.memory_space<vmem>>, vector<1x20xf32>
    %c1 = arith.constant 1 : index
    %c0_1 = arith.constant 0 : index
    %1 = vector.load %arg1[%c1, %c0_1] : memref<4x20xf32, #tpu.memory_space<vmem>>, vector<1x20xf32>
    %c2 = arith.constant 2 : index
    %c0_2 = arith.constant 0 : index
    %2 = vector.load %arg1[%c2, %c0_2] : memref<4x20xf32, #tpu.memory_space<vmem>>, vector<1x20xf32>
    %c3 = arith.constant 3 : index
    %c0_3 = arith.constant 0 : index
    %3 = vector.load %arg1[%c3, %c0_3] : memref<4x20xf32, #tpu.memory_space<vmem>>, vector<1x20xf32>
    %4 = arith.subf %2, %0 : vector<1x20xf32>
    %5 = arith.subf %3, %1 : vector<1x20xf32>
    %6 = arith.mulf %4, %5 : vector<1x20xf32>
    %c0_4 = arith.constant 0 : index
    %c0_5 = arith.constant 0 : index
    %7 = vector.load %arg2[%c0_4, %c0_5] : memref<1x20xf32, #tpu.memory_space<vmem>>, vector<1x20xf32>
    tpu.vector_store %arg2[%c0_4, %c0_5], %6 {strides = array<i32>} : memref<1x20xf32, #tpu.memory_space<vmem>>, vector<1x20xf32>,
    return
  }
  func.func @transform_0(%arg0: i32) -> (i32, i32) {
    %c0_i32 = arith.constant 0 : i32
    %c0_i32_0 = arith.constant 0 : i32
    return %c0_i32, %arg0 : i32, i32
  }
  func.func @transform_1(%arg0: i32) -> (i32, i32) {
    %c0_i32 = arith.constant 0 : i32
    %c0_i32_0 = arith.constant 0 : i32
    return %arg0, %c0_i32 : i32, i32
  }
}

</mosaic_0001>

<bundles_post_ra>
// kernel: tpu_custom_call.1
= control target key start
LH: loop header
LB: loop body
LE: loop exit
PB: predicated region body
PF: predicated region fallthrough
CT: control target
= control target key end

     0   :  { %6 = vsyncpa [#allocation3], 0  ;;  %s131_s0 = inlined_call_operand.hbm [shape: f32[4,20], index: 0, kind: input, shape index: {}]   ;;  %s132_s1 = inlined_call_operand.hbm [shape: f32[1,20], index: 1, kind: output, shape index: {}]  }
   0x1   :  { %7 = vsyncpa [#allocation4], 0  ;;  %s95_s6 = smov [#allocation2]   ;;  %s47_s10 = scalar_lea.hbm %s131_s0, 64 }
   0x2   :  { %s14_s7 = sshll.u32 %s95_s6, 4  ;;  %p48_p0 = scmp.ne.s32.totalorder %s131_s0, %s47_s10  ;;  %s15_s7 = int_to_ptr.vmem [resolvable:$true] %s14_s7 }
   0x3   :  { %p51_p1 = scmp.lt.u32.totalorder %s47_s10, %s131_s0 }
   0x5   :  { %p53_p2 = pnand %p51_p1, %p48_p0 }
   0x7   :  { %56 = shalt.err (!%p53_p2)
}
   0x8   :  { %s57_s15 = scalar_lea.vmem %s15_s7, 64  ;;  %p62_p4 = scmp.lt.s32.totalorder %s15_s7, %s15_s7 }
   0x9   :  { %p58_p3 = scmp.ne.s32.totalorder %s15_s7, %s57_s15  ;;  %p63_p5 = scmp.lt.s32.totalorder %s57_s15, %s57_s15 }
   0xb   :  { %p64_p6 = por %p63_p5, %p62_p4 }
   0xd   :  { %p65_p7 = pnand %p64_p6, %p58_p3 }
   0xf   :  { %68 = shalt.err (!%p65_p7)
}
  0x10   :  { %17 = dma.hbm_to_vmem [thread:$0]  %s131_s0, 64, %s15_s7, [#allocation3]  }
  0x11   :  { %91 = dma.done.wait [#allocation3], 64  }
  0x12   :  { %92 = vsyncadd [#allocation3], 4294967232  ;;  %v21_v0 = vld [vmem:[#allocation2] sm:$0x1]  ;;  %v22_v1 = vld [vmem:[#allocation2 + $0x1] sm:$0x1] }
  0x13   :  { %v23_v2 = vld [vmem:[#allocation2 + $0x2] sm:$0x1]  ;;  %v24_v3 = vld [vmem:[#allocation2 + $0x3] sm:$0x1]  ;;  %s96_s18 = smov [#allocation5]   ;;  %vm28_vm0 = vcmask 155648  }
  0x14   :  { %v25_v4 = vsub.f32 %v23_v2, %v21_v0  ;;  %s36_s19 = sshll.u32 %s96_s18, 4  ;;  %v26_v5 = vsub.f32 %v24_v3, %v22_v1  ;;  %s37_s19 = int_to_ptr.vmem [resolvable:$true] %s36_s19 }
  0x15   :  { %s69_s20 = scalar_lea.vmem %s37_s19, 16  ;;  %s73_s21 = scalar_lea.vmem %s37_s19, 32 }
  0x16   :  { %v27_v6 = vmul.f32 %v26_v5, %v25_v4  ;;  %p70_p8 = scmp.ne.s32.totalorder %s37_s19, %s69_s20  ;;  %p74_p9 = scmp.lt.s32.totalorder %s37_s19, %s37_s19 }
  0x17   :  { %p75_p10 = scmp.lt.s32.totalorder %s73_s21, %s69_s20 }
  0x18   :  { %29 = vst.msk [vmem:[#allocation5] sm:$0x1] %vm28_vm0, %v27_v6 }
  0x19   :  { %p76_p11 = por %p75_p10, %p74_p9 }
  0x1b   :  { %p77_p12 = pnand %p76_p11, %p70_p8 }
  0x1d   :  { %80 = shalt.err (!%p77_p12)
}
  0x1e   :  { %s81_s23 = scalar_lea.hbm %s132_s1, 16 }
  0x1f   :  { %p82_p13 = scmp.ne.s32.totalorder %s132_s1, %s81_s23  ;;  %p85_p0 = scmp.lt.u32.totalorder %s81_s23, %s132_s1 }
  0x21   :  { %p87_p1 = pnand %p85_p0, %p82_p13 }
  0x23   :  { %90 = shalt.err (!%p87_p1)
}
  0x24   :  { %39 = dma.vmem_to_hbm [thread:$0]  %s37_s19, 16, %s132_s1, [#allocation4]  }
  0x25   :  { %93 = dma.done.wait [#allocation4], 16  }
  0x26   :  { %94 = vsyncadd [#allocation4], 4294967280 }
  0x27   :  { %43 = vsyncpa [#allocation3], 1 }
  0x28   :  { %44 = vsyncpa [#allocation4], 1 }

</bundles_post_ra>
